<compile_context>
chip_gen: v5e
topology: v5e:2x2
jax: 0.10.0
libtpu: 0.0.40
codegen_flags: <defaults>
</compile_context>

<pallas_src>
import math

import jax
import jax.numpy as jnp
from jax.experimental import pallas as pl
from jax.experimental.pallas import tpu as pltpu


def _cdiv(a, b):
    return -(-a // b)


def _round_up(a, b):
    return _cdiv(a, b) * b


# ----------------------------------------------------------------------------
# Kernel 1: weighted parameter merge   out = sum_k alpha[k] * stacked[k]
# Gridded over the row axis; alpha resident in SMEM across all grid steps.
# ----------------------------------------------------------------------------
def _merge_kernel(alpha_ref, stacked_ref, out_ref):
    # alpha_ref:   (K,)          SMEM (resident scalars)
    # stacked_ref: (K, TR, 128)  VMEM tile (native param dtype)
    # out_ref:     (TR, 128)     VMEM tile (f32)
    k_models = stacked_ref.shape[0]
    acc = alpha_ref[0] * stacked_ref[0].astype(jnp.float32)
    for k in range(1, k_models):
        acc = acc + alpha_ref[k] * stacked_ref[k].astype(jnp.float32)
    out_ref[...] = acc


def _merge_tile_rows(k_models, r_min, in_itemsize):
    """Generation-tuned merge tile: ~8 MiB live on v5e-, ~16 MiB on v6e/v7x."""
    try:
        kind = jax.devices()[0].device_kind.lower()
    except Exception:  # pragma: no cover - defensive
        kind = ""
    old_gen = any(tag in kind for tag in ("v2", "v3", "v4", "v5"))
    budget_live = (8 if old_gen else 16) << 20          # double-buffered bytes
    per_row_live = 2 * (k_models * in_itemsize + 4) * 128  # inputs + f32 output
    align = 8 * max(1, 4 // max(1, in_itemsize))        # f32: 8, bf16: 16
    cap = max(align, (budget_live // per_row_live) // align * align)
    cap = min(cap, 2048 if old_gen else 4096)
    if r_min >= cap:
        return cap
    return max(align, _round_up(r_min, align))


def merge_flat_params(alpha, stacked, tile_rows):
    """alpha: (K,) f32, stacked: (K, R, 128) -> (R, 128) f32."""
    k, r, lanes = stacked.shape
    assert lanes == 128 and r % tile_rows == 0
    in_itemsize = jnp.dtype(stacked.dtype).itemsize
    live_bytes = 2 * tile_rows * 128 * (k * in_itemsize + 4)
    return pl.pallas_call(
        _merge_kernel,
        out_shape=jax.ShapeDtypeStruct((r, lanes), jnp.float32),
        grid=(r // tile_rows,),
        in_specs=[
            # alpha: whole array in SMEM, available every grid step.
            pl.BlockSpec(memory_space=pltpu.MemorySpace.SMEM),
            # parameter slab: (K, TR, 128) row tiles, auto double-buffered.
            pl.BlockSpec((k, tile_rows, lanes), lambda i: (0, i, 0)),
        ],
        out_specs=pl.BlockSpec((tile_rows, lanes), lambda i: (i, 0)),
        compiler_params=pltpu.CompilerParams(
            dimension_semantics=("parallel",),
            vmem_limit_bytes=int(live_bytes + (4 << 20)),
        ),
    )(alpha, stacked)


def prepare_merge_state(paramslist):
    """Build the (K, R, 128) slab ONCE (depends on paramslist, not alpha)."""
    k = len(paramslist)
    flat = [
        jnp.concatenate([jnp.ravel(p) for p in params]) for params in paramslist
    ]
    n = int(flat[0].shape[0])
    # Keep the native dtype: bf16 model params stream as bf16 (half the HBM
    # bytes); widening to f32 happens inside the kernel.
    stacked = jnp.stack(flat)
    r_min = _cdiv(n, 128)
    tile_rows = _merge_tile_rows(k, r_min, jnp.dtype(stacked.dtype).itemsize)
    n_pad = _round_up(n, tile_rows * 128)
    if n_pad > n:
        stacked = jnp.pad(stacked, ((0, 0), (0, n_pad - n)))
    slab = stacked.reshape(k, n_pad // 128, 128)
    return slab, n, tile_rows


# ----------------------------------------------------------------------------
# Kernel 2: gridded evaluation over the validation set
#   per row-tile: logits = X @ W + b (bf16 MXU, f32 acc), argmax, compare to
#   labels, emit per-tile correct count.  Partials are summed in the wrapper.
# ----------------------------------------------------------------------------
def _eval_kernel(x_ref, w_ref, b_ref, y_ref, o_ref):
    # x_ref: (TN, Hp) bf16    w_ref: (Hp, Cp) bf16 (resident, zero-padded)
    # b_ref: (1, Cp) f32 (padded cols = -1e30, resident)
    # y_ref: (TN, 1) f32 labels (padded rows = -1)
    # o_ref: (1, 1, 1) f32 -> per-tile number of correct predictions
    logits = (
        jnp.dot(x_ref[...], w_ref[...], preferred_element_type=jnp.float32)
        + b_ref[...]
    )
    # First-occurrence argmax via max + min-index-among-maxima (f32 iota keeps
    # the lane reduction in f32; class ids < 2^24 are exact in f32).
    col = jax.lax.broadcasted_iota(jnp.float32, logits.shape, 1)
    max_val = jnp.max(logits, axis=-1, keepdims=True)
    pred = jnp.min(
        jnp.where(logits == max_val, col, jnp.float32(3.0e38)),
        axis=-1, keepdims=True)                          # (TN, 1)
    correct = (pred == y_ref[...]).astype(jnp.float32)   # (TN, 1)
    o_ref[...] = jnp.sum(correct).reshape(1, 1, 1)


def fused_eval(x_pad, w_pad, b_pad, y_pad, tile_rows):
    """Returns (num_tiles, 1, 1) per-tile correct counts."""
    n_pad, h_pad = x_pad.shape
    c_pad = w_pad.shape[1]
    num_tiles = n_pad // tile_rows
    return pl.pallas_call(
        _eval_kernel,
        out_shape=jax.ShapeDtypeStruct((num_tiles, 1, 1), jnp.float32),
        grid=(num_tiles,),
        in_specs=[
            pl.BlockSpec((tile_rows, h_pad), lambda i: (i, 0)),   # streamed X
            pl.BlockSpec((h_pad, c_pad), lambda i: (0, 0)),       # resident W
            pl.BlockSpec((1, c_pad), lambda i: (0, 0)),           # resident b
            pl.BlockSpec((tile_rows, 1), lambda i: (i, 0)),       # streamed y
        ],
        out_specs=pl.BlockSpec((1, 1, 1), lambda i: (i, 0, 0)),
        compiler_params=pltpu.CompilerParams(
            dimension_semantics=("parallel",)),
    )(x_pad, w_pad, b_pad, y_pad)


def prepare_eval_state(valid_inputs, valid_labels):
    """Pad/cast the validation set ONCE (independent of alpha)."""
    nb, bsz, h = valid_inputs.shape
    n = nb * bsz
    h_pad = _round_up(h, 128)                 # lane-dense contraction dim
    tn = 512 if n >= 512 else max(16, _round_up(n, 16))
    n_pad = _round_up(n, tn)
    x = valid_inputs.reshape(n, h).astype(jnp.bfloat16)   # bf16 MXU stream
    x = jnp.pad(x, ((0, n_pad - n), (0, h_pad - h)))
    y = valid_labels.reshape(n, 1).astype(jnp.float32)
    y = jnp.pad(y, ((0, n_pad - n), (0, 0)), constant_values=-1.0)
    return x, y, tn, n, h_pad


# ----------------------------------------------------------------------------
# Glue: AlphaWrapper-equivalent forward
# ----------------------------------------------------------------------------
def alpha_wrapper_forward(alpha, merge_state, param_shapes, eval_state):
    """Equivalent of AlphaWrapper.forward(train_x).

    alpha:        (K,) merge coefficients  (== train_x)
    merge_state:  prepare_merge_state(paramslist) output (built once)
    param_shapes: shapes of the model parameters, here (W, b)
    eval_state:   prepare_eval_state(...) output (built once)
    """
    # --- (1) merge ALL parameters with one gridded Pallas call ---------------
    slab, n_total, tile_rows = merge_state
    merged_slab = merge_flat_params(alpha.astype(jnp.float32), slab, tile_rows)
    merged_flat = merged_slab.reshape(-1)[:n_total]

    merged, off = [], 0
    for shp in param_shapes:
        size = math.prod(shp)
        merged.append(merged_flat[off:off + size].reshape(shp))
        off += size
    w_merged, b_merged = merged                     # (H, C), (C,)

    # --- (2) evaluate merged model over the validation "dataloader" ----------
    x_pad, y_pad, tn, n_valid, h_pad = eval_state
    h, c = w_merged.shape
    c_pad = _round_up(c, 128)                       # lane-dense class dim
    w_pad = (jnp.zeros((h_pad, c_pad), jnp.float32)
             .at[:h, :c].set(w_merged)
             .astype(jnp.bfloat16))                 # bf16 MXU weights
    # padded logit columns get -1e30 via the bias so they never win argmax
    b_pad = jnp.full((1, c_pad), -1e30, jnp.float32).at[:, :c].set(b_merged)

    partials = fused_eval(x_pad, w_pad, b_pad, y_pad, tn)
    correct = jnp.sum(partials)
    # All batches have equal size, so the mean over per-batch accuracies equals
    # total correct / total examples (matches the original averaging).
    return correct / n_valid


# ----------------------------------------------------------------------------
if __name__ == "__main__":
    key = jax.random.PRNGKey(0)
    K = 3            # number of models being merged
    HIDDEN = 32      # feature dim
    NUM_CLASSES = 8
    BATCH = 8
    NUM_BATCHES = 4

    # Deterministic per-model parameters (W: [H, C], b: [C]).
    param_shapes = [(HIDDEN, NUM_CLASSES), (NUM_CLASSES,)]
    keys = jax.random.split(key, 2 * K + 3)
    paramslist = tuple(
        (
            0.1 * jax.random.normal(keys[2 * k], param_shapes[0], jnp.float32),
            0.1 * jax.random.normal(keys[2 * k + 1], param_shapes[1], jnp.float32),
        )
        for k in range(K)
    )

    # Merge coefficients (== train_x in the PyTorch module).
    alpha = jax.nn.softmax(jax.random.normal(keys[-3], (K,), jnp.float32))

    # Synthetic validation "dataloader".
    valid_inputs = jax.random.normal(
        keys[-2], (NUM_BATCHES, BATCH, HIDDEN), jnp.float32)
    valid_labels = jax.random.randint(
        keys[-1], (NUM_BATCHES, BATCH), 0, NUM_CLASSES, jnp.int32)

    # Hoisted, alpha-independent preprocessing (done ONCE; reused per forward).
    merge_state = prepare_merge_state(paramslist)
    eval_state = prepare_eval_state(valid_inputs, valid_labels)

    result = alpha_wrapper_forward(alpha, merge_state, param_shapes, eval_state)
    result = jax.block_until_ready(result)

    # Pure-JAX reference check of the whole forward (mirrors the kernel's
    # bf16 MXU inputs with f32 accumulation).
    w_ref = sum(a * p[0] for a, p in zip(alpha, paramslist)).astype(jnp.float32)
    b_ref = sum(a * p[1] for a, p in zip(alpha, paramslist)).astype(jnp.float32)
    accs = []
    for b in range(NUM_BATCHES):
        logits = jnp.dot(valid_inputs[b].astype(jnp.bfloat16),
                         w_ref.astype(jnp.bfloat16),
                         preferred_element_type=jnp.float32) + b_ref
        accs.append(jnp.mean(
            (jnp.argmax(logits, -1) == valid_labels[b]).astype(jnp.float32)))
    ref = sum(accs) / NUM_BATCHES
    assert abs(float(result) - float(ref)) < 1e-5, (float(result), float(ref))

    print("KERNEL_OK")
</pallas_src>

<mosaic_0001>
module attributes {stable_mosaic.version = 11 : i64} {
  func.func @_merge_kernel(%arg0: i32, %arg1: memref<3xf32, #tpu.memory_space<smem>>, %arg2: memref<3x8x128xf32, #tpu.memory_space<vmem>>, %arg3: memref<8x128xf32, #tpu.memory_space<vmem>>) attributes {dimension_semantics = [#tpu.dimension_semantics<parallel>], iteration_bounds = array<i64: 1>, scalar_prefetch = 0 : i64, scratch_operands = 0 : i64, tpu.core_type = #tpu.core_type<tc>, window_params = [{transform_indices = @transform_0, window_bounds = array<i64: 3>}, {transform_indices = @transform_1, window_bounds = array<i64: 3, 8, 128>}, {transform_indices = @transform_2, window_bounds = array<i64: 8, 128>}]} {
    %c0 = arith.constant 0 : index
    %0 = memref.load %arg1[%c0] : memref<3xf32, #tpu.memory_space<smem>>
    %c0_0 = arith.constant 0 : index
    %c0_1 = arith.constant 0 : index
    %c0_2 = arith.constant 0 : index
    %1 = vector.load %arg2[%c0_0, %c0_1, %c0_2] : memref<3x8x128xf32, #tpu.memory_space<vmem>>, vector<1x8x128xf32>
    %2 = vector.shape_cast %1 : vector<1x8x128xf32> to vector<8x128xf32>
    %3 = vector.broadcast %0 : f32 to vector<8x128xf32>
    %4 = arith.mulf %3, %2 : vector<8x128xf32>
    %c1 = arith.constant 1 : index
    %5 = memref.load %arg1[%c1] : memref<3xf32, #tpu.memory_space<smem>>
    %c1_3 = arith.constant 1 : index
    %c0_4 = arith.constant 0 : index
    %c0_5 = arith.constant 0 : index
    %6 = vector.load %arg2[%c1_3, %c0_4, %c0_5] : memref<3x8x128xf32, #tpu.memory_space<vmem>>, vector<1x8x128xf32>
    %7 = vector.shape_cast %6 : vector<1x8x128xf32> to vector<8x128xf32>
    %8 = vector.broadcast %5 : f32 to vector<8x128xf32>
    %9 = arith.mulf %8, %7 : vector<8x128xf32>
    %10 = arith.addf %4, %9 : vector<8x128xf32>
    %c2 = arith.constant 2 : index
    %11 = memref.load %arg1[%c2] : memref<3xf32, #tpu.memory_space<smem>>
    %c2_6 = arith.constant 2 : index
    %c0_7 = arith.constant 0 : index
    %c0_8 = arith.constant 0 : index
    %12 = vector.load %arg2[%c2_6, %c0_7, %c0_8] : memref<3x8x128xf32, #tpu.memory_space<vmem>>, vector<1x8x128xf32>
    %13 = vector.shape_cast %12 : vector<1x8x128xf32> to vector<8x128xf32>
    %14 = vector.broadcast %11 : f32 to vector<8x128xf32>
    %15 = arith.mulf %14, %13 : vector<8x128xf32>
    %16 = arith.addf %10, %15 : vector<8x128xf32>
    %c0_9 = arith.constant 0 : index
    %c0_10 = arith.constant 0 : index
    %17 = vector.load %arg3[%c0_9, %c0_10] : memref<8x128xf32, #tpu.memory_space<vmem>>, vector<8x128xf32>
    tpu.vector_store %arg3[%c0_9, %c0_10], %16 {strides = array<i32>} : memref<8x128xf32, #tpu.memory_space<vmem>>, vector<8x128xf32>,
    return
  }
  func.func @transform_0(%arg0: i32) -> i32 {
    %c0_i32 = arith.constant 0 : i32
    %c0_i32_0 = arith.constant 0 : i32
    return %c0_i32 : i32
  }
  func.func @transform_1(%arg0: i32) -> (i32, i32, i32) {
    %c0_i32 = arith.constant 0 : i32
    %c0_i32_0 = arith.constant 0 : i32
    %c0_i32_1 = arith.constant 0 : i32
    return %c0_i32, %arg0, %c0_i32_0 : i32, i32, i32
  }
  func.func @transform_2(%arg0: i32) -> (i32, i32) {
    %c0_i32 = arith.constant 0 : i32
    %c0_i32_0 = arith.constant 0 : i32
    return %arg0, %c0_i32 : i32, i32
  }
}

</mosaic_0001>

<bundles_post_ra>
// kernel: tpu_custom_call.1
= control target key start
LH: loop header
LB: loop body
LE: loop exit
PB: predicated region body
PF: predicated region fallthrough
CT: control target
= control target key end

     0   :  { %7 = vsyncpa [#allocation5], 0  ;;  %s178_s0 = inlined_call_operand.hbm [shape: f32[3], index: 0, kind: input, shape index: {}]   ;;  %s179_s1 = inlined_call_operand.hbm [shape: f32[3,8,128], index: 1, kind: input, shape index: {}]   ;;  %s180_s2 = inlined_call_operand.hbm [shape: f32[8,128], index: 2, kind: output, shape index: {}]  }
   0x1   :  { %8 = vsyncpa [#allocation3], 0 }
   0x2   :  { %9 = vsyncpa [#allocation4], 0  ;;  %s15_s11 = sshll.u32 %s178_s0, 4  ;;  %s23_s14 = sshll.u32 %s179_s1, 4  ;;  %s16_s11 = int_to_ptr.hbm [resolvable:$true] %s15_s11  ;;  %s24_s14 = int_to_ptr.hbm [resolvable:$true] %s23_s14 }
   0x3   :  { %s149_s15 = smov [#allocation2]   ;;  %s150_s16 = smov [#allocation6]  }
   0x4   :  { %18 = dma.hbm_to_smem %s16_s11, 16, %s149_s15, [#allocation5]  }
   0x5   :  { %s25_s17 = sshll.u32 %s150_s16, 4  ;;  %s151_s18 = smov 128   ;;  %s26_s17 = int_to_ptr.vmem [resolvable:$true] %s25_s17 }
   0x6   :  { %s152_s19 = smov 8  }
   0x7   :  { %31 = dma.hbm_to_vmem [thread:$0]  %s24_s14, 384, %s26_s17, [#allocation3], %s151_s18, %s151_s18, %s152_s19  }
   0x8   :  { %143 = dma.done.wait [#allocation5], 16  }
   0x9   :  { %144 = vsyncadd [#allocation5], 4294967280 }
   0xa   :  { %145 = dma.done.wait [#allocation3], 384  }
   0xb   :  { %146 = vsyncadd [#allocation3], 4294966912 }
   0xc   :  { %40 = sfence }
   0xd   :  { %s41_s0 = sld [smem:[#allocation2]]  ;;  %v42_v0 = vld [vmem:[#allocation6] sm:$0xff]  ;;  %v47_v1 = vld [vmem:[#allocation6 + $0x8] sm:$0xff]  ;;  %v53_v3 = vld [vmem:[#allocation6 + $0x10] sm:$0xff]  ;;  %s153_s1 = smov [#allocation7]  }
   0xe   :  { %s76_s20 = sld [smem:[#allocation2 + $0x1]]  ;;  %s63_s22 = sshll.u32 %s153_s1, 4  ;;  %s64_s22 = int_to_ptr.vmem [resolvable:$true] %s63_s22 }
   0xf   :  { %s77_s21 = sld [smem:[#allocation2 + $0x2]]  ;;  %s65_s25 = sshll.u32 %s180_s2, 4  ;;  %s66_s25 = int_to_ptr.hbm [resolvable:$true] %s65_s25 }
  0x13   :  { %v43_v2 = vstv %s41_s0 }
  0x14   :  { %v44_v4 = vmul.f32 %v43_v2, %v42_v0  ;;  %v48_v5 = vstv %s76_s20 }
  0x15   :  { %v49_v6 = vmul.f32 %v48_v5, %v47_v1  ;;  %v54_v7 = vstv %s77_s21 }
  0x16   :  { %v55_v8 = vmul.f32 %v54_v7, %v53_v3 }
  0x17   :  { %v50_v9 = vadd.f32 %v49_v6, %v44_v4 }
  0x19   :  { %v56_v10 = vadd.f32 %v55_v8, %v50_v9 }
  0x1b   :  { %57 = vst [vmem:[#allocation7] sm:$0xff] %v56_v10 }
  0x1c   :  { %68 = dma.vmem_to_hbm [thread:$0]  %s64_s22, 128, %s66_s25, [#allocation4]  }
  0x1d   :  { %147 = dma.done.wait [#allocation4], 128  }
  0x1e   :  { %148 = vsyncadd [#allocation4], 4294967168 }
  0x1f   :  { %73 = vsyncpa [#allocation3], 1 }
  0x20   :  { %74 = vsyncpa [#allocation4], 1 }
  0x21   :  { %75 = vsyncpa [#allocation5], 1 }

</bundles_post_ra>
